<compile_context>
chip_gen: v7x
topology: tpu7x:2x2x1
jax: 0.10.0
libtpu: 0.0.40
codegen_flags: <defaults>
</compile_context>

<pallas_src>
import jax
import jax.numpy as jnp
from jax import lax
from jax.experimental import pallas as pl
from jax.experimental.pallas import tpu as pltpu


# ----------------------------- Pallas kernel --------------------------------

def _make_kernel(Cin, Cout, K, stride, Hout, Wout, negative_slope):
    HW = Hout * Wout

    def kernel(x_ref, w_ref, b_ref, o_ref):
        # x_ref: (1, Cin, Hp, Wp)   bf16  -- whole padded image for this batch idx
        # w_ref: (Cout, K*K*Cin)    bf16  -- (dh, dw)-major, channel-minor flattening
        # b_ref: (Cout, 1)          f32
        # o_ref: (1, Cout, HW)      f32/bf16 -- lane-dense (flattened H*W on lanes)
        x = x_ref[0]                                           # (Cin, Hp, Wp)

        # In-VMEM im2col: K*K static window slices, stacked on the channel axis.
        cols = []
        for dh in range(K):
            for dw in range(K):
                cols.append(
                    x[:,
                      dh:dh + (Hout - 1) * stride + 1:stride,
                      dw:dw + (Wout - 1) * stride + 1:stride])  # (Cin, Hout, Wout)
        xg = jnp.concatenate(cols, axis=0)                      # (K*K*Cin, Hout, Wout)
        xg = xg.reshape(K * K * Cin, HW)                        # collapse trailing dims

        # Single MXU matmul, f32 accumulate; then fused bias + LeakyReLU.
        acc = jnp.dot(w_ref[...], xg,
                      preferred_element_type=jnp.float32)       # (Cout, HW)
        acc = acc + b_ref[...]
        o_ref[0] = jnp.where(acc >= 0.0, acc, negative_slope * acc).astype(o_ref.dtype)

    return kernel


# ------------------------------- Wrapper ------------------------------------

def nonorm_conv2d(x_nchw, weight, bias, *, stride, padding,
                  out_dtype=jnp.float32, negative_slope=0.01):
    """Conv2d(cin, cout, k, stride, padding) -> LeakyReLU(0.01). NCHW in/out.

    bf16 MXU operands (intentional precision trade-off), f32 accumulation.
    Set out_dtype=jnp.bfloat16 to also halve the output HBM writeback.
    """
    N, Cin, H, W = x_nchw.shape
    Cout, Cin_w, K, K2 = weight.shape
    assert Cin_w == Cin and K == K2
    s, p = stride, padding
    Hout = (H + 2 * p - K) // s + 1
    Wout = (W + 2 * p - K) // s + 1
    HW = Hout * Wout
    Hp, Wp = H + 2 * p, W + 2 * p
    Kdim = K * K * Cin

    # Cast to bf16 BEFORE padding: the only HBM intermediate is the padded image,
    # at half width and ~1x input bytes (no K^2 im2col blow-up).
    xp = jnp.pad(x_nchw.astype(jnp.bfloat16), ((0, 0), (0, 0), (p, p), (p, p)))

    # torch Conv2d weight (Cout, Cin, kh, kw) -> (Cout, kh, kw, Cin) -> (Cout, Kdim);
    # matches the in-kernel concat order ((dh, dw)-major, channel-minor).  The
    # contraction is padded internally by the compiler (no HBM patch array exists
    # anymore, so no explicit 16-multiple padding is required).
    w_mat = weight.transpose(0, 2, 3, 1).reshape(Cout, Kdim).astype(jnp.bfloat16)
    b2d = bias.reshape(Cout, 1).astype(jnp.float32)

    kernel = _make_kernel(Cin, Cout, K, s, Hout, Wout, negative_slope)

    out = pl.pallas_call(
        kernel,
        out_shape=jax.ShapeDtypeStruct((N, Cout, HW), out_dtype),
        grid=(N,),
        in_specs=[
            # Whole padded image per batch index (block == full trailing dims).
            pl.BlockSpec((1, Cin, Hp, Wp), lambda n: (n, 0, 0, 0)),
            pl.BlockSpec((Cout, Kdim), lambda n: (0, 0)),
            pl.BlockSpec((Cout, 1), lambda n: (0, 0)),
        ],
        # Lane-dense output tile: flattened H*W (=256 here) on the lane axis.
        out_specs=pl.BlockSpec((1, Cout, HW), lambda n: (n, 0, 0)),
        compiler_params=pltpu.CompilerParams(
            # N parallel blocks: v7x's two TensorCores each take one image.
            dimension_semantics=("parallel",),
            vmem_limit_bytes=32 * 1024 * 1024,  # safe on v5e/v6e/v7x; tiles are tiny
        ),
    )(xp, w_mat, b2d)

    # Flattened H*W maps straight back to NCHW (no transpose, no lane padding).
    return out.reshape(N, Cout, Hout, Wout)


# ------------------------ pure-JAX reference (sanity) -----------------------

def _reference(x, weight, bias, *, stride, padding, negative_slope=0.01):
    y = lax.conv_general_dilated(
        x.astype(jnp.float32), weight.astype(jnp.float32),
        window_strides=(stride, stride),
        padding=[(padding, padding), (padding, padding)],
        dimension_numbers=("NCHW", "OIHW", "NCHW"))
    y = y + bias.reshape(1, -1, 1, 1)
    return jnp.where(y >= 0.0, y, negative_slope * y)


# ----------------------------------- main -----------------------------------

if __name__ == "__main__":
    # nonorm_Conv2d(cin=4, cout=8, kernel_size=3, stride=1, padding=1)
    cin, cout, ksize, stride, padding = 4, 8, 3, 1, 1
    N, H, W = 2, 16, 16

    key = jax.random.PRNGKey(0)
    kx, kw, kb = jax.random.split(key, 3)

    x = jax.random.normal(kx, (N, cin, H, W), dtype=jnp.float32)
    # Deterministic synthetic params (Conv2d weight shape: (cout, cin, kh, kw)).
    bound = 1.0 / (cin * ksize * ksize) ** 0.5
    weight = jax.random.uniform(kw, (cout, cin, ksize, ksize),
                                minval=-bound, maxval=bound, dtype=jnp.float32)
    bias = jax.random.uniform(kb, (cout,), minval=-bound, maxval=bound,
                              dtype=jnp.float32)

    out = nonorm_conv2d(x, weight, bias, stride=stride, padding=padding)
    out = jax.block_until_ready(out)

    ref = _reference(x, weight, bias, stride=stride, padding=padding)
    assert out.shape == (N, cout, H, W), out.shape
    # bf16 MXU operands (f32 accumulate) vs f32 reference -> loosened tolerance.
    max_err = float(jnp.max(jnp.abs(out - ref)))
    assert jnp.allclose(out, ref, atol=2e-2, rtol=2e-2), max_err

    print("KERNEL_OK")
</pallas_src>

<mosaic_0001>
module attributes {stable_mosaic.version = 11 : i64} {
  func.func @kernel(%arg0: i32, %arg1: memref<1x4x18x18xbf16, #tpu.memory_space<vmem>>, %arg2: memref<8x36xbf16, #tpu.memory_space<vmem>>, %arg3: memref<8x1xf32, #tpu.memory_space<vmem>>, %arg4: memref<1x8x256xf32, #tpu.memory_space<vmem>>) attributes {dimension_semantics = [#tpu.dimension_semantics<parallel>], iteration_bounds = array<i64: 2>, scalar_prefetch = 0 : i64, scratch_operands = 0 : i64, tpu.core_type = #tpu.core_type<tc>, window_params = [{transform_indices = @transform_0, window_bounds = array<i64: 1, 4, 18, 18>}, {pipeline_mode = #tpu.pipeline_mode<synchronous>, transform_indices = @transform_1, window_bounds = array<i64: 8, 36>}, {pipeline_mode = #tpu.pipeline_mode<synchronous>, transform_indices = @transform_2, window_bounds = array<i64: 8, 1>}, {transform_indices = @transform_3, window_bounds = array<i64: 1, 8, 256>}]} {
    %c0 = arith.constant 0 : index
    %c0_0 = arith.constant 0 : index
    %c0_1 = arith.constant 0 : index
    %c0_2 = arith.constant 0 : index
    %0 = vector.load %arg1[%c0, %c0_0, %c0_1, %c0_2] : memref<1x4x18x18xbf16, #tpu.memory_space<vmem>>, vector<1x4x18x18xbf16>
    %1 = vector.shape_cast %0 : vector<1x4x18x18xbf16> to vector<4x18x18xbf16>
    %2 = vector.extract_strided_slice %1 {offsets = [0, 0, 0], sizes = [4, 16, 16], strides = [1, 1, 1]} : vector<4x18x18xbf16> to vector<4x16x16xbf16>
    %3 = vector.extract_strided_slice %1 {offsets = [0, 0, 1], sizes = [4, 16, 16], strides = [1, 1, 1]} : vector<4x18x18xbf16> to vector<4x16x16xbf16>
    %4 = vector.extract_strided_slice %1 {offsets = [0, 0, 2], sizes = [4, 16, 16], strides = [1, 1, 1]} : vector<4x18x18xbf16> to vector<4x16x16xbf16>
    %5 = vector.extract_strided_slice %1 {offsets = [0, 1, 0], sizes = [4, 16, 16], strides = [1, 1, 1]} : vector<4x18x18xbf16> to vector<4x16x16xbf16>
    %6 = vector.extract_strided_slice %1 {offsets = [0, 1, 1], sizes = [4, 16, 16], strides = [1, 1, 1]} : vector<4x18x18xbf16> to vector<4x16x16xbf16>
    %7 = vector.extract_strided_slice %1 {offsets = [0, 1, 2], sizes = [4, 16, 16], strides = [1, 1, 1]} : vector<4x18x18xbf16> to vector<4x16x16xbf16>
    %8 = vector.extract_strided_slice %1 {offsets = [0, 2, 0], sizes = [4, 16, 16], strides = [1, 1, 1]} : vector<4x18x18xbf16> to vector<4x16x16xbf16>
    %9 = vector.extract_strided_slice %1 {offsets = [0, 2, 1], sizes = [4, 16, 16], strides = [1, 1, 1]} : vector<4x18x18xbf16> to vector<4x16x16xbf16>
    %10 = vector.extract_strided_slice %1 {offsets = [0, 2, 2], sizes = [4, 16, 16], strides = [1, 1, 1]} : vector<4x18x18xbf16> to vector<4x16x16xbf16>
    %11 = tpu.concatenate %2, %3, %4, %5, %6, %7, %8, %9, %10 in 0 : vector<4x16x16xbf16>, vector<4x16x16xbf16>, vector<4x16x16xbf16>, vector<4x16x16xbf16>, vector<4x16x16xbf16>, vector<4x16x16xbf16>, vector<4x16x16xbf16>, vector<4x16x16xbf16>, vector<4x16x16xbf16> -> vector<36x16x16xbf16>
    %12 = vector.shape_cast %11 : vector<36x16x16xbf16> to vector<36x256xbf16>
    %c0_3 = arith.constant 0 : index
    %c0_4 = arith.constant 0 : index
    %13 = vector.load %arg2[%c0_3, %c0_4] : memref<8x36xbf16, #tpu.memory_space<vmem>>, vector<8x36xbf16>
    %cst = arith.constant dense<0.000000e+00> : vector<8x256xf32>
    %14 = tpu.matmul %13, %12, %cst {dimension_numbers = #tpu.dot_dimension_numbers<[1], [0], [0], [1], [0, 0, 1, 1], [], []>} : vector<8x36xbf16>, vector<36x256xbf16>, vector<8x256xf32> -> vector<8x256xf32>
    %c0_5 = arith.constant 0 : index
    %c0_6 = arith.constant 0 : index
    %15 = vector.load %arg3[%c0_5, %c0_6] : memref<8x1xf32, #tpu.memory_space<vmem>>, vector<8x1xf32>
    %16 = vector.broadcast %15 : vector<8x1xf32> to vector<8x256xf32>
    %17 = arith.addf %14, %16 : vector<8x256xf32>
    %cst_7 = arith.constant 0.000000e+00 : f32
    %18 = vector.broadcast %cst_7 : f32 to vector<8x256xf32>
    %19 = arith.cmpf oge, %17, %18 : vector<8x256xf32>
    %cst_8 = arith.constant 0.00999999977 : f32
    %20 = vector.broadcast %cst_8 : f32 to vector<8x256xf32>
    %21 = arith.mulf %20, %17 : vector<8x256xf32>
    %22 = arith.select %19, %17, %21 : vector<8x256xi1>, vector<8x256xf32>
    %c0_9 = arith.constant 0 : index
    %c0_10 = arith.constant 0 : index
    %c0_11 = arith.constant 0 : index
    %23 = vector.load %arg4[%c0_9, %c0_10, %c0_11] : memref<1x8x256xf32, #tpu.memory_space<vmem>>, vector<1x8x256xf32>
    %24 = vector.shape_cast %23 : vector<1x8x256xf32> to vector<8x256xf32>
    %25 = vector.shape_cast %22 : vector<8x256xf32> to vector<1x8x256xf32>
    tpu.vector_store %arg4[%c0_9, %c0_10, %c0_11], %25 {strides = array<i32>} : memref<1x8x256xf32, #tpu.memory_space<vmem>>, vector<1x8x256xf32>,
    return
  }
  func.func @transform_0(%arg0: i32) -> (i32, i32, i32, i32) {
    %c0_i32 = arith.constant 0 : i32
    %c0_i32_0 = arith.constant 0 : i32
    %c0_i32_1 = arith.constant 0 : i32
    %c0_i32_2 = arith.constant 0 : i32
    return %arg0, %c0_i32, %c0_i32_0, %c0_i32_1 : i32, i32, i32, i32
  }
  func.func @transform_1(%arg0: i32) -> (i32, i32) {
    %c0_i32 = arith.constant 0 : i32
    %c0_i32_0 = arith.constant 0 : i32
    %c0_i32_1 = arith.constant 0 : i32
    return %c0_i32, %c0_i32_0 : i32, i32
  }
  func.func @transform_2(%arg0: i32) -> (i32, i32) {
    %c0_i32 = arith.constant 0 : i32
    %c0_i32_0 = arith.constant 0 : i32
    %c0_i32_1 = arith.constant 0 : i32
    return %c0_i32, %c0_i32_0 : i32, i32
  }
  func.func @transform_3(%arg0: i32) -> (i32, i32, i32) {
    %c0_i32 = arith.constant 0 : i32
    %c0_i32_0 = arith.constant 0 : i32
    %c0_i32_1 = arith.constant 0 : i32
    return %arg0, %c0_i32, %c0_i32_0 : i32, i32, i32
  }
}

</mosaic_0001>

<bundles_post_ra>
// kernel: tpu_custom_call.1
= control target key start
LH: loop header
LB: loop body
LE: loop exit
PB: predicated region body
PF: predicated region fallthrough
CT: control target
= control target key end

     0   :  { %8 = vsyncpa [#allocation3], 0  ;;  %s3067_s0 = inlined_call_operand.vmem [shape: bf16[2,4,18,18], index: 0, kind: input, shape index: {}]   ;;  %s3068_s1 = inlined_call_operand.vmem [shape: bf16[8,36], index: 1, kind: input, shape index: {}]   ;;  %s3069_s2 = inlined_call_operand.vmem [shape: f32[8,1], index: 2, kind: input, shape index: {}]   ;;  %s3070_s3 = inlined_call_operand.hbm [shape: f32[2,8,256], index: 3, kind: output, shape index: {}]  }
   0x1   :  { %10 = vsyncpa [#allocation3 + $0x1], 0  ;;  %s2136_s12 = smov 0   ;;  %s2138_s13 = smov 0  }
   0x2   :  { %s2140_s14 = smov 0   ;;  %s2142_s15 = smov 0  }
   0x3 LB: > { %s2157_s16 = sadd.s32 4294967295, %s2101_s15   ;;  %s1896_s17 = sadd.s32 4294967294, %s2101_s15   ;;  %s2101_s15 = sphi %s2142_s15, %s3097_s15   ;;  %s2097_s14 = sphi %s2140_s14, %s3096_s14   ;;  %s2093_s13 = sphi %s2138_s13, %s3095_s13   ;;  %s2089_s12 = sphi %s2136_s12, %s3094_s12  }
   0x4   : > { %s2161_s18 = sadd.s32 1, %s2101_s15   ;;  %s91_s19 = sadd.s32 1, %s2097_s14 }
   0x5   : > { %s88_s20 = ssub.s32 %s2101_s15, %s2161_s18  ;;  %p101_p0 = scmp.ne.s32.totalorder %s2097_s14, %s2093_s13 }
   0x6   : > { %p89_p1 = scmp.eq.s32.totalorder %s88_s20, 0  ;;  %p102_p2 = scmp.eq.s32.totalorder %s2157_s16, 1 }
   0x7   : > { %p107_p3 = scmp.ne.s32.totalorder %s2093_s13, %s2089_s12  ;;  %p108_p4 = scmp.eq.s32.totalorder %s1896_s17, 1 }
   0x8   : > { %s2172_s21 = scalar_select %p89_p1, %s2097_s14, %s91_s19  }
   0x9   : > { %p2174_p5 = por %p102_p2, %p101_p0  ;;  %p2178_p6 = por %p108_p4, %p107_p3 }
   0xa   : > { %p1899_p7 = scmp.ge.s32.totalorder %s2101_s15, 1  ;;  %p140_p8 = scmp.lt.s32.totalorder %s2101_s15, 3 }
   0xc   : > { %p141_p9 = pnand %p1899_p7, %p140_p8 }
   0xe   : > { %144 = sbr.rel (%p141_p9) target bundleno = 644 (0x284), region = 32 }
  0x15   : > { %p164_p10 = scmp.lt.s32.totalorder %s2157_s16, 1  ;;  %s2103_s29 = smov 127   ;;  %vm222_vm0 = vsmask.f32 3328  ;;  %vm223_vm1 = vsmask.f32 7440 }
  0x16   : > { %s2104_s30 = smov 126   ;;  %vm2295_vm2 = vmor %vm222_vm0, %vm223_vm1  ;;  %vm357_vm3 = vcmask 1042432   ;;  %vm358_vm4 = vcmask 1046532   ;;  %s2107_s4 = smov 32   ;;  %vm1656_vm6 = vcmask 130048   ;;  %vm1666_vm7 = vcmask 261120  }
  0x17   : > { %s165_s24 = scalar_select %p164_p10, %s2157_s16, 1  ;;  %vm2412_vm5 = vmor %vm357_vm3, %vm358_vm4  ;;  %vm1673_vm8 = vcmask 392192   ;;  %vm1680_vm9 = vcmask 523264   ;;  %vm1687_vm10 = vcmask 654336   ;;  %vm1694_vm11 = vcmask 785408  }
  0x18   : > { %s2108_s5 = smov 64   ;;  %s2109_s6 = smov 16   ;;  %vm1701_vm12 = vcmask 916480   ;;  %vm1768_vm13 = vcmask 1041408   ;;  %vm1764_vm14 = vcmask 293888  }
  0x19   : > { %s1986_s25 = smul.u32 48, %s165_s24  ;;  %s2110_s7 = smov 48  }
  0x1a   : > { %s2111_s8 = smov 96   ;;  %s2112_s9 = smov 80  }
  0x1b   : > { %s2189_s28 = scalar_lea.vmem %s3067_s0, %s1986_s25  ;;  %s2113_s10 = smov 112  }
  0x1c   : > { %v2192_v0 = vld [vmem:[%s2189_s28 + $0x1c] sm:$0xf]  ;;  %v2195_v1 = vld [vmem:[%s2189_s28 + $0x4] sm:$0xf]  ;;  %v2198_v2 = vld [vmem:[%s2189_s28 + $0x28] sm:$0xf] }
  0x1d   : > { %200 = vrot.lane.b32.xlu1 %v2192_v0, %s2103_s29  ;;  %192 = vrot.lane.b32.xlu0 %v2195_v1, %s2103_s29  ;;  %v2205_v3 = vld [vmem:[%s2189_s28 + $0x10] sm:$0xf]  ;;  %v556_v4 = vpack.i.b16 %v2198_v2, %v2192_v0  ;;  %v235_v6 = vshll.u32 %v2195_v1, 16  ;;  %v239_v7 = vshrl.u32 %v2195_v1, 16  ;;  %v2220_v10 = vld [vmem:[%s2189_s28 + $0x14] sm:$0x1] }
  0x1e   : > { %v552_v5 = vpack.i.b16 %v2205_v3, %v2195_v1  ;;  %v259_v8 = vshll.u32 %v2205_v3, 16  ;;  %v263_v9 = vshrl.u32 %v2205_v3, 16  ;;  %v307_v11 = vshll.u32 %v2198_v2, 16  ;;  %v2229_v13 = vld [vmem:[%s2189_s28 + $0x8] sm:$0x1]  ;;  %s161_s24 = sand.u32 1, %s2093_s13  }
  0x1f   : > { %v311_v12 = vshrl.u32 %v2198_v2, 16  ;;  %v2231_v14 = vrot.slane %v235_v6, 5  ;;  %v241_v15 = vrot.slane %v239_v7, 4  ;;  %v283_v16 = vshll.u32 %v2192_v0, 16  ;;  %v2242_v20 = vld [vmem:[%s2189_s28 + $0x2c] sm:$0x1] }
  0x20   : > { %v287_v17 = vshrl.u32 %v2192_v0, 16  ;;  %v2237_v18 = vrot.slane %v259_v8, 5  ;;  %v265_v19 = vrot.slane %v263_v9, 4  ;;  %v2245_v21 = vld [vmem:[%s2189_s28 + $0x20] sm:$0x1]  ;;  %v269_v22 = vshll.u32 %v2220_v10, 16 }
  0x21   : > { %204 = vrot.lane.b32.xlu1 %v2198_v2, %s2103_s29  ;;  %196 = vrot.lane.b32.xlu0 %v2205_v3, %s2103_s29  ;;  %v245_v23 = vshll.u32 %v2229_v13, 16  ;;  %v2249_v24 = vrot.slane %v307_v11, 5  ;;  %v313_v25 = vrot.slane %v311_v12, 4  ;;  %v242_v26 = vor.u32 %v241_v15, %v2231_v14  ;;  %v2264_v30 = vld [vmem:[%s2189_s28 + $0xc] sm:$0xf]  ;;  %s1900_s25 = sshll.u32 %s161_s24, 4 }
  0x22   : > { %v317_v27 = vshll.u32 %v2242_v20, 16  ;;  %v2259_v28 = vrot.slane %v283_v16, 5  ;;  %v289_v29 = vrot.slane %v287_v17, 4  ;;  %v2267_v31 = vld [vmem:[%s2189_s28] sm:$0xf]  ;;  %v266_v32 = vor.u32 %v265_v19, %v2237_v18  ;;  %s1985_s26 = sshll.u32 %s2157_s16, 8 }
  0x23   : > { %v293_v33 = vshll.u32 %v2245_v21, 16  ;;  %v250_v34 = vshrl.u32 %v2264_v30, 16  ;;  %v271_v35 = vrot.slane %v269_v22, 5  ;;  %v314_v36 = vor.u32 %v313_v25, %v2249_v24  ;;  %v2280_v39 = vld [vmem:[%s2189_s28 + $0x24] sm:$0xf]  ;;  %s163_s27 = scalar_lea.vmem [#allocation2], %s1900_s25 }
  0x24   : > { %v253_v37 = vshll.u32 %v2264_v30, 16  ;;  %v226_v38 = vshrl.u32 %v2267_v31, 16  ;;  %v243_v40 = vrot.slane %v242_v26, 4  ;;  %v247_v41 = vrot.slane %v245_v23, 5  ;;  %v2284_v44 = vld [vmem:[%s2189_s28 + $0x18] sm:$0xf] }
  0x25   : > { %212 = vrot.lane.b32.xlu1 %v2205_v3, %s2104_s30  ;;  %208 = vrot.lane.b32.xlu0 %v2195_v1, %s2104_s30  ;;  %v319_v42 = vrot.slane %v317_v27, 5  ;;  %v290_v43 = vor.u32 %v289_v29, %v2259_v28  ;;  %v267_v45 = vrot.slane %v266_v32, 4  ;;  %v295_v46 = vrot.slane %v293_v33, 5  ;;  %s1837_s28 = sshll.u32 %s163_s27, 4  ;;  %s1823_s16 = scalar_lea.sflag [#allocation3], %s161_s24  ;;  %s3027_s28 = int_to_ptr.vmem [resolvable:$true] %s1837_s28 }
  0x26   : > { %v252_v47 = vrot.slane %v250_v34, 4  ;;  %v255_v48 = vrot.slane %v253_v37, 5  ;;  %v228_v49 = vrot.slane %v226_v38, 4  ;;  %v229_v50 = vshll.u32 %v2267_v31, 16 }
  0x27   : > { %v298_v51 = vshrl.u32 %v2280_v39, 16  ;;  %v301_v52 = vshll.u32 %v2280_v39, 16  ;;  %v315_v54 = vrot.slane %v314_v36, 4  ;;  %v274_v56 = vshrl.u32 %v2284_v44, 16 }
  0x28   : > { %v256_v55 = vor.u32 %v255_v48, %v252_v47  ;;  %v277_v57 = vshll.u32 %v2284_v44, 16  ;;  %v291_v58 = vrot.slane %v290_v43, 4  ;;  %v231_v59 = vrot.slane %v229_v50, 5 }
  0x29   : > { %220 = vrot.lane.b32.xlu1 %v2198_v2, %s2104_s30  ;;  %216 = vrot.lane.b32.xlu0 %v2192_v0, %s2104_s30  ;;  %v300_v60 = vrot.slane %v298_v51, 4  ;;  %v303_v61 = vrot.slane %v301_v52, 5  ;;  %v276_v63 = vrot.slane %v274_v56, 4  ;;  %v2307_v8 = vsel %vm2295_vm2, %v267_v45, %v271_v35 }
  0x2a   : > { %v257_v62 = vrot.slane %v256_v55, 4  ;;  %v279_v6 = vrot.slane %v277_v57, 5  ;;  %v2311_v11 = vsel %vm2295_vm2, %v243_v40, %v247_v41  ;;  %v232_v15 = vor.u32 %v231_v59, %v228_v49 }
  0x2b   : > { %v304_v16 = vor.u32 %v303_v61, %v300_v60  ;;  %v597_v19 = vshrl.u32 %v2307_v8, 16  ;;  %v596_v22 = vshrl.u32 %v2311_v11, 16  ;;  %v2317_v23 = vsel %vm2295_vm2, %v315_v54, %v319_v42 }
  0x2c   : > { %v280_v25 = vor.u32 %v279_v6, %v276_v63  ;;  %v605_v26 = vshrl.u32 %v2317_v23, 16  ;;  %v2326_v27 = vsel %vm2295_vm2, %v291_v58, %v295_v46  ;;  %v233_v29 = vrot.slane %v232_v15, 4 }
  0x2d   : > { %194 = vrot.lane.b32.xlu1 %v2264_v30, %s2103_s29  ;;  %190 = vrot.lane.b32.xlu0 %v2267_v31, %s2103_s29  ;;  %v305_v32 = vrot.slane %v304_v16, 4  ;;  %v604_v33 = vshrl.u32 %v2326_v27, 16  ;;  %v2332_v35 = vsel %vm2295_vm2, %v257_v62, %v2237_v18  ;;  %v2338_v37 = vpack.i.b16 %v311_v12, %v287_v17 }
  0x2e   : > { %v281_v36 = vrot.slane %v280_v25, 4  ;;  %v465_v40 = vshrl.u32 %v2332_v35, 16  ;;  %v2344_v41 = vsel %vm2295_vm2, %v233_v29, %v2231_v14  ;;  %v2355_v18 = vpack.i.b16 %v263_v9, %v239_v7 }
  0x2f   : > { %v2349_v42 = vsel %vm2295_vm2, %v305_v32, %v2249_v24  ;;  %v464_v12 = vshrl.u32 %v2344_v41, 16  ;;  %v594_v7 = vpack.i.b16 %v2307_v8, %v2311_v11  ;;  %v2371_v9 = vpack.i.b16 %v597_v19, %v596_v22 }
  0x30   : > { %v473_v17 = vshrl.u32 %v2349_v42, 16  ;;  %v2362_v14 = vsel %vm2295_vm2, %v281_v36, %v2259_v28  ;;  %v602_v43 = vpack.i.b16 %v2317_v23, %v2326_v27  ;;  %v2375_v45 = vpack.i.b16 %v605_v26, %v604_v33 }
  0x31   : > { %202 = vrot.lane.b32.xlu1 %v2280_v39, %s2103_s29  ;;  %198 = vrot.lane.b32.xlu0 %v2284_v44, %s2103_s29  ;;  %v472_v24 = vshrl.u32 %v2362_v14, 16  ;;  %v420_v28 = vpack.i.b16 %v2264_v30, %v2267_v31  ;;  %v2383_v46 = vpack.i.b16 %v250_v34, %v226_v38  ;;  %v424_v47 = vpack.i.b16 %v2280_v39, %v2284_v44 }
  0x32   : > { %v2387_v48 = vpack.i.b16 %v298_v51, %v274_v56  ;;  %v462_v49 = vpack.i.b16 %v2332_v35, %v2344_v41  ;;  %v2391_v50 = vpack.i.b16 %v465_v40, %v464_v12  ;;  %v470_v52 = vpack.i.b16 %v2349_v42, %v2362_v14 }
  0x33   : > { %v2395_v53 = vpack.i.b16 %v473_v17, %v472_v24  ;;  %v369_v34 = vrot.slane %v2205_v3, 5  ;;  %v362_v38 = vrot.slane %v2195_v1, 5  ;;  %v372_v54 = vrot.slane %v2220_v10, 5 }
  0x34   : > { %v365_v57 = vrot.slane %v2229_v13, 5  ;;  %v383_v58 = vrot.slane %v2198_v2, 5  ;;  %v376_v59 = vrot.slane %v2192_v0, 5  ;;  %v386_v60 = vrot.slane %v2242_v20, 5 }
  0x35   : > { %210 = vrot.lane.b32.xlu1 %v2264_v30, %s2104_s30  ;;  %206 = vrot.lane.b32.xlu0 %v2267_v31, %s2104_s30  ;;  %v371_v51 = vrot.slane %v369_v34, 4  ;;  %v364_v56 = vrot.slane %v362_v38, 4  ;;  %v379_v63 = vrot.slane %v2245_v21, 5  ;;  %v1903_v21 = vrot.slane %v2264_v30, 9 }
  0x36   : > { %v385_v13 = vrot.slane %v383_v58, 4  ;;  %v378_v62 = vrot.slane %v376_v59, 4  ;;  %v1902_v15 = vrot.slane %v2267_v31, 9  ;;  %v1905_v32 = vrot.slane %v2280_v39, 9 }
  0x37   : > { %v2425_v10 = vsel %vm2412_vm5, %v371_v51, %v372_v54  ;;  %v2430_v61 = vsel %vm2412_vm5, %v364_v56, %v365_v57  ;;  %v2457_v16 = vsel %vm2412_vm5, %v1903_v21, %v369_v34  ;;  %v1904_v33 = vrot.slane %v2284_v44, 9 }
  0x38   : > { %v2439_v6 = vsel %vm2412_vm5, %v385_v13, %v386_v60  ;;  %v2443_v20 = vsel %vm2412_vm5, %v378_v62, %v379_v63  ;;  %v2461_v19 = vsel %vm2412_vm5, %v1902_v15, %v362_v38  ;;  %v513_v22 = vshrl.u32 %v2457_v16, 16 }
  0x39   : > { %218 = vrot.lane.b32.xlu1 %v2280_v39, %s2104_s30  ;;  %214 = vrot.lane.b32.xlu0 %v2284_v44, %s2104_s30  ;;  %v512_v25 = vshrl.u32 %v2461_v19, 16  ;;  %v2489_v36 = vsel %vm2412_vm5, %v1905_v32, %v383_v58  ;;  %v2493_v40 = vsel %vm2412_vm5, %v1904_v33, %v376_v59  ;;  %v2105_v12 = vmov 1983009808  }
  0x3a   : > { %v686_v17 = vunpack.c.l.s4 %v2105_v12  ;;  %v688_v24 = vlaneseq  ;;  %v2106_v12 = vmov 1934713408  }
  0x3b   : > { %v2471_v29 = vpack.i.b16 %v513_v22, %v512_v25 }
  0x3c   : > { %v687_v51 = vunpack.c.0.s8 %v686_v17  ;;  %v689_v54 = vshrl.u32 %v688_v24, 7  ;;  %v703_v17 = vunpack.c.l.s4 %v2106_v12 }
  0x3d   : > { %327 = vrot.lane.b32.xlu1 %v2307_v8, %s2103_s29  ;;  %323 = vrot.lane.b32.xlu0 %v2311_v11, %s2103_s29 }
  0x3e   : > { %v2515_v57 = vsub.s32 %v687_v51, %v689_v54 }
  0x41   : > { %335 = vrot.lane.b32.xlu1 %v2317_v23, %s2103_s29  ;;  %331 = vrot.lane.b32.xlu0 %v2326_v27, %s2103_s29 }
  0x45   : > { %343 = vrot.lane.b32.xlu1 %v2307_v8, %s2104_s30  ;;  %339 = vrot.lane.b32.xlu0 %v2311_v11, %s2104_s30 }
  0x49   : > { %351 = vrot.lane.b32.xlu1 %v2317_v23, %s2104_s30  ;;  %347 = vrot.lane.b32.xlu0 %v2326_v27, %s2104_s30 }
  0x4d   : > { %394 = vrot.lane.b32.xlu1 %v2425_v10, %s2103_s29  ;;  %390 = vrot.lane.b32.xlu0 %v2430_v61, %s2103_s29 }
  0x51   : > { %402 = vrot.lane.b32.xlu1 %v2439_v6, %s2103_s29  ;;  %398 = vrot.lane.b32.xlu0 %v2443_v20, %s2103_s29 }
  0x55   : > { %325 = vrot.lane.b32.xlu1 %v2332_v35, %s2103_s29  ;;  %321 = vrot.lane.b32.xlu0 %v2344_v41, %s2103_s29 }
  0x59   : > { %333 = vrot.lane.b32.xlu1 %v2349_v42, %s2103_s29  ;;  %329 = vrot.lane.b32.xlu0 %v2362_v14, %s2103_s29 }
  0x5d   : > { %341 = vrot.lane.b32.xlu1 %v2332_v35, %s2104_s30  ;;  %337 = vrot.lane.b32.xlu0 %v2344_v41, %s2104_s30 }
  0x61   : > { %349 = vrot.lane.b32.xlu1 %v2349_v42, %s2104_s30  ;;  %345 = vrot.lane.b32.xlu0 %v2362_v14, %s2104_s30 }
  0x65   : > { %392 = vrot.lane.b32.xlu1 %v2457_v16, %s2103_s29  ;;  %388 = vrot.lane.b32.xlu0 %v2461_v19, %s2103_s29 }
  0x69   : > { %400 = vrot.lane.b32.xlu1 %v2489_v36, %s2103_s29  ;;  %396 = vrot.lane.b32.xlu0 %v2493_v40, %s2103_s29 }
  0x6d   : > { %406 = vrot.lane.b32.xlu1 %v2430_v61, %s2104_s30  ;;  %404 = vrot.lane.b32.xlu0 %v2461_v19, %s2104_s30 }
  0x71   : > { %410 = vrot.lane.b32.xlu1 %v2425_v10, %s2104_s30  ;;  %408 = vrot.lane.b32.xlu0 %v2457_v16, %s2104_s30 }
  0x75   : > { %414 = vrot.lane.b32.xlu1 %v2443_v20, %s2104_s30  ;;  %412 = vrot.lane.b32.xlu0 %v2493_v40, %s2104_s30 }
  0x79   : > { %418 = vrot.lane.b32.xlu1 %v2439_v6, %s2104_s30  ;;  %416 = vrot.lane.b32.xlu0 %v2489_v36, %s2104_s30 }
  0x8f   : > { %v201_v34 = vpop.permute.xlu1 %200  ;;  %v193_v38 = vpop.permute.xlu0 %192 }
  0x90   : > { %v572_v55 = vshrl.u32 %v201_v34, 16  ;;  %v564_v56 = vshrl.u32 %v193_v38, 16 }
  0x93   : > { %v205_v58 = vpop.permute.xlu1 %204  ;;  %v197_v59 = vpop.permute.xlu0 %196 }
  0x94   : > { %v570_v60 = vpack.i.b16 %v205_v58, %v201_v34  ;;  %v573_v13 = vshrl.u32 %v205_v58, 16  ;;  %v562_v62 = vpack.i.b16 %v197_v59, %v193_v38  ;;  %v565_v63 = vshrl.u32 %v197_v59, 16 }
  0x96   : > { %v574_v21 = vpack.i.b16 %v573_v13, %v572_v55  ;;  %v1032_v15 = vcombine.low %v556_v4, %v570_v60  ;;  %v566_v22 = vpack.i.b16 %v565_v63, %v564_v56  ;;  %v1024_v25 = vcombine.low %v552_v5, %v562_v62 }
  0x97   : > { %v213_v32 = vpop.permute.xlu1 %212  ;;  %v209_v33 = vpop.permute.xlu0 %208  ;;  %v704_v60 = vunpack.c.0.s8 %v703_v17 }
  0x98   : > { %v1039_v24 = vrot.slane %v1032_v15, %v2515_v57  ;;  %v1066_v34 = vcombine.low %v2338_v37, %v574_v21  ;;  %v1031_v38 = vrot.slane %v1024_v25, %v2515_v57  ;;  %v1058_v51 = vcombine.low %v2355_v18, %v566_v22 }
  0x99   : > { %v581_v55 = vshrl.u32 %v213_v32, 16  ;;  %v578_v0 = vpack.i.b16 %v213_v32, %v209_v33  ;;  %v580_v2 = vshrl.u32 %v209_v33, 16  ;;  %v2545_v32 = vsub.s32 %v704_v60, %v689_v54 }
  0x9a   : > { %v2528_v4 = vrot.slane %v1066_v34, %v2515_v57  ;;  %v1040_v1 = vcombine.low %v1031_v38, %v1039_v24  ;;  %v1041_v3 = vcombine.high %v1031_v38, %v1039_v24  ;;  %v2531_v5 = vrot.slane %v1058_v51, %v2515_v57 }
  0x9b   : > { %v582_v56 = vpack.i.b16 %v581_v55, %v580_v2  ;;  %v1092_v37 = vcombine.low %v578_v0, %v594_v7  ;;  %v221_v58 = vpop.permute.xlu1 %220  ;;  %v217_v59 = vpop.permute.xlu0 %216 }
  0x9c   : > { %v589_v18 = vshrl.u32 %v221_v58, 16  ;;  %v586_v13 = vpack.i.b16 %v221_v58, %v217_v59  ;;  %v588_v62 = vshrl.u32 %v217_v59, 16  ;;  %v1074_v63 = vcombine.low %v2531_v5, %v2528_v4 }
  0x9d   : > { %v1075_v22 = vcombine.high %v2531_v5, %v2528_v4  ;;  %v1099_v8 = vrot.slane %v1092_v37, %v2515_v57  ;;  %v1126_v11 = vcombine.low %v582_v56, %v2371_v9  ;;  %v2555_v0 = vrot.slane %v1040_v1, %v2545_v32 }
  0x9e   : > { %v590_v21 = vpack.i.b16 %v589_v18, %v588_v62  ;;  %v1100_v15 = vcombine.low %v586_v13, %v602_v43  ;;  %v2558_v5 = vrot.slane %v1041_v3, %v2545_v32  ;;  %v1082_v31 = vrot.slane %v1074_v63, %v2545_v32 }
  0x9f   : > { %v195_v7 = vpop.permute.xlu1 %194  ;;  %v191_v25 = vpop.permute.xlu0 %190  ;;  %v1133_v9 = vrot.slane %v1126_v11, %v2515_v57 }
  0xa0   : > { %v1107_v33 = vrot.slane %v1100_v15, %v2515_v57  ;;  %v1134_v12 = vcombine.low %v590_v21, %v2375_v45  ;;  %v433_v17 = vshrl.u32 %v195_v7, 16  ;;  %v430_v24 = vpack.i.b16 %v195_v7, %v191_v25 }
  0xa1   : > { %v432_v34 = vshrl.u32 %v191_v25, 16 }
  0xa2   : > { %v1108_v23 = vcombine.low %v1099_v8, %v1107_v33  ;;  %v1109_v27 = vcombine.high %v1099_v8, %v1107_v33  ;;  %v1141_v43 = vrot.slane %v1134_v12, %v2515_v57  ;;  %v684_v38 = vcombine.low %v420_v28, %v430_v24 }
  0xa3   : > { %v434_v51 = vpack.i.b16 %v433_v17, %v432_v34  ;;  %v203_v54 = vpop.permute.xlu1 %202  ;;  %v199_v55 = vpop.permute.xlu0 %198  ;;  %v2584_v12 = vrot.slane %v1075_v22, %v2545_v32 }
  0xa4   : > { %v441_v45 = vshrl.u32 %v203_v54, 16  ;;  %v438_v2 = vpack.i.b16 %v203_v54, %v199_v55  ;;  %v440_v4 = vshrl.u32 %v199_v55, 16  ;;  %v2561_v56 = vrot.slane %v1108_v23, %v2545_v32 }
  0xa5   : > { %v2564_v30 = vrot.slane %v1109_v27, %v2545_v32  ;;  %v1142_v28 = vcombine.low %v1133_v9, %v1141_v43  ;;  %v691_v37 = vrot.slane %v684_v38, %v2515_v57  ;;  %v1143_v59 = vcombine.high %v1133_v9, %v1141_v43 }
  0xa6   : > { %v442_v58 = vpack.i.b16 %v441_v45, %v440_v4  ;;  %v692_v1 = vcombine.low %v424_v47, %v438_v2  ;;  %v718_v3 = vcombine.low %v2383_v46, %v434_v51  ;;  %v1973_v13 = vcombine.high %v2555_v0, %v2561_v56 }
  0xa7   : > { %v211_v60 = vpop.permute.xlu1 %210  ;;  %v207_v18 = vpop.permute.xlu0 %206  ;;  %v1942_v62 = vcombine.low %v2558_v5, %v2564_v30  ;;  %v1150_v63 = vrot.slane %v1142_v28, %v2545_v32  ;;  %v1979_v11 = vcombine.high %v2558_v5, %v2564_v30  ;;  %v2588_v23 = vrot.slane %v1143_v59, %v2545_v32 }
  0xa8   : > { %v699_v21 = vrot.slane %v692_v1, %v2515_v57  ;;  %v726_v15 = vcombine.low %v2387_v48, %v442_v58  ;;  %v449_v8 = vshrl.u32 %v211_v60, 16  ;;  %v446_v39 = vpack.i.b16 %v211_v60, %v207_v18  ;;  %1555 = vrot.lane.b32.xlu0 %v1973_v13, %s2107_s4 }
  0xa9   : > { %v448_v44 = vshrl.u32 %v207_v18, 16  ;;  %v1933_v46 = vcombine.low %v1082_v31, %v1150_v63  ;;  %v1976_v47 = vcombine.high %v1082_v31, %v1150_v63  ;;  %v725_v48 = vrot.slane %v718_v3, %v2515_v57 }
  0xaa   : > { %v700_v7 = vcombine.low %v691_v37, %v699_v21  ;;  %v701_v25 = vcombine.high %v691_v37, %v699_v21  ;;  %v733_v33 = vrot.slane %v726_v15, %v2515_v57  ;;  %v752_v43 = vcombine.low %v446_v39, %v462_v49 }
  0xab   : > { %v450_v17 = vpack.i.b16 %v449_v8, %v448_v44  ;;  %v219_v24 = vpop.permute.xlu1 %218  ;;  %v215_v34 = vpop.permute.xlu0 %214  ;;  %v1945_v45 = vcombine.low %v2584_v12, %v2588_v23  ;;  %v1982_v49 = vcombine.high %v2584_v12, %v2588_v23  ;;  %v3085_v23 = vpack.i.b16 %v2457_v16, %v2461_v19 }
  0xac   : > { %v457_v38 = vshrl.u32 %v219_v24, 16  ;;  %v454_v9 = vpack.i.b16 %v219_v24, %v215_v34  ;;  %v456_v51 = vshrl.u32 %v215_v34, 16  ;;  %1593 = vrot.lane.b32.xlu0 %v1942_v62, %s2108_s5  ;;  %v734_v22 = vcombine.low %v725_v48, %v733_v33 }
  0xad   : > { %v735_v2 = vcombine.high %v725_v48, %v733_v33  ;;  %v786_v4 = vcombine.low %v450_v17, %v2391_v50  ;;  %v759_v31 = vrot.slane %v752_v43, %v2515_v57  ;;  %v2619_v59 = vrot.slane %v700_v7, %v2545_v32 }
  0xae   : > { %v458_v54 = vpack.i.b16 %v457_v38, %v456_v51  ;;  %v760_v55 = vcombine.low %v454_v9, %v470_v52  ;;  %v742_v63 = vrot.slane %v734_v22, %v2545_v32 }
  0xaf   : > { %v2602_v35 = vpop.permute.xlu1 %327  ;;  %v2604_v41 = vpop.permute.xlu0 %323  ;;  %v793_v37 = vrot.slane %v786_v4, %v2515_v57  ;;  %3081 = vst [vmem:[#allocation5_spill] sm:$0xff] %v2619_v59  ;;  %v2631_v21 = vrot.slane %v735_v2, %v2545_v32  ;;  %v642_v2 = vpack.i.b16 %v2425_v10, %v2430_v61 }
  0xb0   : > { %v767_v28 = vrot.slane %v760_v55, %v2515_v57  ;;  %v794_v42 = vcombine.low %v458_v54, %v2395_v53  ;;  %1536 = vrot.lane.b32.xlu0 %v1933_v46, %s2109_s6  ;;  %v715_v53 = vrot.slane %v701_v25, %v2545_v32  ;;  %v610_v54 = vpack.i.b16 %v2602_v35, %v2604_v41 }
  0xb2   : > { %v768_v14 = vcombine.low %v759_v31, %v767_v28  ;;  %v769_v52 = vcombine.high %v759_v31, %v767_v28  ;;  %v801_v50 = vrot.slane %v794_v42, %v2515_v57  ;;  %v650_v28 = vpack.i.b16 %v2439_v6, %v2443_v20 }
  0xb3   : > { %v2614_v58 = vpop.permute.xlu1 %335  ;;  %v2616_v1 = vpop.permute.xlu0 %331 }
  0xb4   : > { %v2622_v3 = vrot.slane %v768_v14, %v2545_v32  ;;  %1574 = vrot.lane.b32.xlu0 %v1976_v47, %s2110_s7  ;;  %v783_v60 = vrot.slane %v769_v52, %v2545_v32  ;;  %v802_v18 = vcombine.low %v793_v37, %v801_v50  ;;  %v803_v13 = vcombine.high %v793_v37, %v801_v50 }
  0xb5   : > { %v618_v38 = vpack.i.b16 %v2614_v58, %v2616_v1 }
  0xb6   : > { %3082 = vst [vmem:[#allocation6_spill] sm:$0xff] %v2622_v3  ;;  %v1961_v62 = vcombine.high %v2619_v59, %v2622_v3  ;;  %v1918_v44 = vcombine.low %v715_v53, %v783_v60  ;;  %v1967_v46 = vcombine.high %v715_v53, %v783_v60  ;;  %v810_v47 = vrot.slane %v802_v18, %v2545_v32 }
  0xb7   : > { %v2635_v8 = vpop.permute.xlu1 %343  ;;  %v2637_v39 = vpop.permute.xlu0 %339  ;;  %v2641_v7 = vrot.slane %v803_v13, %v2545_v32 }
  0xb8   : > { %1409 = vrot.lane.b32.xlu1 %v1961_v62, %s2107_s4  ;;  %v1909_v25 = vcombine.low %v742_v63, %v810_v47  ;;  %v1964_v33 = vcombine.high %v742_v63, %v810_v47  ;;  %v626_v9 = vpack.i.b16 %v2635_v8, %v2637_v39 }
  0xb9   : > { %v1921_v48 = vcombine.low %v2631_v21, %v2641_v7 }
  0xba   : > { %v1160_v31 = vcombine.low %v610_v54, %v626_v9  ;;  %v644_v54 = vshrl.u32 %v2430_v61, 16  ;;  %v629_v61 = vshrl.u32 %v2635_v8, 16 }
  0xbb   : > { %v2648_v24 = vpop.permute.xlu1 %351  ;;  %v2650_v34 = vpop.permute.xlu0 %347 }
  0xbc   : > { %v634_v43 = vpack.i.b16 %v2648_v24, %v2650_v34  ;;  %1447 = vrot.lane.b32.xlu1 %v1918_v44, %s2108_s5  ;;  %v2686_v5 = vrot.slane %v1160_v31, %v2515_v57 }
  0xbe   : > { %v1168_v55 = vcombine.low %v618_v38, %v634_v43 }
  0xbf   : > { %v2659_v51 = vpop.permute.xlu1 %394  ;;  %v2661_v22 = vpop.permute.xlu0 %390 }
  0xc0   : > { %v658_v4 = vpack.i.b16 %v2659_v51, %v2661_v22  ;;  %1631 = vrot.lane.b32.xlu1 %v1979_v11, %s2111_s8  ;;  %v2680_v52 = vrot.slane %v1168_v55, %v2515_v57  ;;  %v653_v55 = vshrl.u32 %v2439_v6, 16  ;;  %v628_v6 = vshrl.u32 %v2637_v39, 16 }
  0xc2   : > { %v1228_v50 = vcombine.low %v642_v2, %v658_v4  ;;  %v1176_v60 = vcombine.low %v2686_v5, %v2680_v52  ;;  %v652_v2 = vshrl.u32 %v2443_v20, 16  ;;  %v630_v27 = vpack.i.b16 %v629_v61, %v628_v6 }
  0xc3   : > { %v2675_v42 = vpop.permute.xlu1 %402  ;;  %v2677_v14 = vpop.permute.xlu0 %398 }
  0xc4   : > { %v666_v37 = vpack.i.b16 %v2675_v42, %v2677_v14  ;;  %1485 = vrot.lane.b32.xlu1 %v1967_v46, %s2111_s8  ;;  %v2695_v18 = vrot.slane %v1228_v50, %v2515_v57  ;;  %v2709_v46 = vrot.slane %v1176_v60, %v2545_v32  ;;  %v520_v50 = vshrl.u32 %v2493_v40, 16 }
  0xc5   : > { %v636_v60 = vshrl.u32 %v2650_v34, 16 }
  0xc6   : > { %v1236_v30 = vcombine.low %v650_v28, %v666_v37  ;;  %3083 = vst [vmem:[#allocation7_spill] sm:$0xff] %v2709_v46  ;;  %v521_v28 = vshrl.u32 %v2489_v36, 16  ;;  %v613_v37 = vshrl.u32 %v2602_v35, 16  ;;  %v660_v35 = vshrl.u32 %v2661_v22, 16 }
  0xc7   : > { %v2688_v11 = vpop.permute.xlu1 %325  ;;  %v2690_v53 = vpop.permute.xlu0 %321  ;;  %v654_v22 = vpack.i.b16 %v653_v55, %v652_v2  ;;  %v3086_v55 = vcombine.high %v2631_v21, %v2641_v7 }
  0xc8   : > { %v2698_v13 = vrot.slane %v1236_v30, %v2515_v57  ;;  %1390 = vrot.lane.b32.xlu1 %v1909_v25, %s2109_s6  ;;  %v637_v30 = vshrl.u32 %v2648_v24, 16  ;;  %v620_v24 = vshrl.u32 %v2616_v1, 16  ;;  %v518_v1 = vpack.i.b16 %v2489_v36, %v2493_v40 }
  0xc9   : > { %v522_v40 = vpack.i.b16 %v521_v28, %v520_v50 }
  0xca   : > { %v1244_v62 = vcombine.low %v2695_v18, %v2698_v13  ;;  %v638_v17 = vpack.i.b16 %v637_v30, %v636_v60 }
  0xcb   : > { %v2703_v63 = vpop.permute.xlu1 %333  ;;  %v2705_v44 = vpop.permute.xlu0 %329 }
  0xcc   : > { %1428 = vrot.lane.b32.xlu1 %v1964_v33, %s2110_s7  ;;  %v2712_v47 = vrot.slane %v1244_v62, %v2545_v32  ;;  %v645_v33 = vshrl.u32 %v2425_v10, 16  ;;  %v621_v10 = vshrl.u32 %v2614_v58, 16  ;;  %v661_v62 = vshrl.u32 %v2659_v51, 16 }
  0xcd   : > { %v486_v58 = vpack.i.b16 %v2703_v63, %v2705_v44 }
  0xce   : > { %3084 = vst [vmem:[#allocation8_spill] sm:$0xff] %v2712_v47  ;;  %v1974_v43 = vcombine.high %v2709_v46, %v2712_v47  ;;  %v646_v51 = vpack.i.b16 %v645_v33, %v644_v54  ;;  %v662_v26 = vpack.i.b16 %v661_v62, %v660_v35  ;;  %v622_v12 = vpack.i.b16 %v621_v10, %v620_v24 }
  0xcf   : > { %v2718_v38 = vpop.permute.xlu1 %341  ;;  %v2720_v9 = vpop.permute.xlu0 %337 }
  0xd0   : > { %1557 = vrot.lane.b32.xlu0 %v1974_v43, %s2107_s4  ;;  %1612 = vrot.lane.b32.xlu1 %v1945_v45, %s2112_s9  ;;  %v612_v45 = vshrl.u32 %v2604_v41, 16  ;;  %v669_v41 = vshrl.u32 %v2675_v42, 16  ;;  %v494_v8 = vpack.i.b16 %v2718_v38, %v2720_v9  ;;  %v478_v42 = vpack.i.b16 %v2688_v11, %v2690_v53 }
  0xd1   : > { %v496_v50 = vshrl.u32 %v2720_v9, 16  ;;  %v481_v9 = vshrl.u32 %v2688_v11, 16 }
  0xd2   : > { %v820_v47 = vcombine.low %v478_v42, %v494_v8 }
  0xd3   : > { %v2731_v4 = vpop.permute.xlu1 %349  ;;  %v2733_v31 = vpop.permute.xlu0 %345 }
  0xd4   : > { %1466 = vrot.lane.b32.xlu1 %v1921_v48, %s2112_s9  ;;  %v502_v20 = vpack.i.b16 %v2731_v4, %v2733_v31  ;;  %v668_v48 = vshrl.u32 %v2677_v14, 16  ;;  %v2775_v16 = vrot.slane %v820_v47, %v2515_v57  ;;  %v505_v7 = vshrl.u32 %v2731_v4, 16 }
  0xd5   : > { %v504_v28 = vshrl.u32 %v2733_v31, 16  ;;  %v497_v47 = vshrl.u32 %v2718_v38, 16  ;;  %v1177_v31 = vcombine.high %v2686_v5, %v2680_v52  ;;  %v480_v52 = vshrl.u32 %v2690_v53, 16 }
  0xd6   : > { %v828_v14 = vcombine.low %v486_v58, %v502_v20  ;;  %v1245_v20 = vcombine.high %v2695_v18, %v2698_v13 }
  0xd7   : > { %v393_v39 = vpop.permute.xlu1 %392  ;;  %v389_v43 = vpop.permute.xlu0 %388  ;;  %v506_v5 = vpack.i.b16 %v505_v7, %v504_v28  ;;  %v482_v42 = vpack.i.b16 %v481_v9, %v480_v52 }
  0xd8   : > { %v529_v25 = vshrl.u32 %v393_v39, 16  ;;  %v526_v34 = vpack.i.b16 %v393_v39, %v389_v43  ;;  %v528_v15 = vshrl.u32 %v389_v43, 16  ;;  %1650 = vrot.lane.b32.xlu1 %v1982_v49, %s2113_s10  ;;  %v614_v39 = vpack.i.b16 %v613_v37, %v612_v45 }
  0xd9   : > { %v670_v43 = vpack.i.b16 %v669_v41, %v668_v48  ;;  %v2772_v36 = vrot.slane %v828_v14, %v2515_v57  ;;  %v1262_v37 = vcombine.low %v646_v51, %v662_v26  ;;  %v498_v48 = vpack.i.b16 %v497_v47, %v496_v50 }
  0xda   : > { %v530_v46 = vpack.i.b16 %v529_v25, %v528_v15  ;;  %v888_v49 = vcombine.low %v3085_v23, %v526_v34  ;;  %v1194_v15 = vcombine.low %v614_v39, %v630_v27  ;;  %v1202_v25 = vcombine.low %v622_v12, %v638_v17 }
  0xdb   : > { %v401_v3 = vpop.permute.xlu1 %400  ;;  %v397_v59 = vpop.permute.xlu0 %396  ;;  %v1270_v10 = vcombine.low %v654_v22, %v670_v43  ;;  %v488_v17 = vshrl.u32 %v2705_v44, 16  ;;  %v2825_v11 = vrot.slane %v1262_v37, %v2515_v57  ;;  %v2833_v51 = vrot.slane %v1177_v31, %v2545_v32 }
  0xdc   : > { %v537_v33 = vshrl.u32 %v401_v3, 16  ;;  %v534_v54 = vpack.i.b16 %v401_v3, %v397_v59  ;;  %1504 = vrot.lane.b32.xlu1 %v3086_v55, %s2113_s10  ;;  %v536_v2 = vshrl.u32 %v397_v59, 16  ;;  %v922_v19 = vcombine.low %v2471_v29, %v530_v46 }
  0xdd   : > { %v895_v27 = vrot.slane %v888_v49, %v2515_v57  ;;  %v489_v59 = vshrl.u32 %v2703_v63, 16  ;;  %v836_v29 = vcombine.low %v2775_v16, %v2772_v36  ;;  %v2807_v38 = vrot.slane %v1270_v10, %v2515_v57 }
  0xde   : > { %v896_v45 = vcombine.low %v518_v1, %v534_v54  ;;  %v538_v3 = vpack.i.b16 %v537_v33, %v536_v2  ;;  %v2797_v63 = vrot.slane %v922_v19, %v2515_v57  ;;  %v2822_v41 = vrot.slane %v1194_v15, %v2515_v57 }
  0xdf   : > { %v2778_v61 = vpop.permute.xlu1 %406  ;;  %v2780_v21 = vpop.permute.xlu0 %404  ;;  %v2812_v18 = vrot.slane %v836_v29, %v2545_v32  ;;  %v490_v53 = vpack.i.b16 %v489_v59, %v488_v17  ;;  %v2828_v58 = vrot.slane %v1202_v25, %v2515_v57  ;;  %v2836_v22 = vrot.slane %v1245_v20, %v2545_v32 }
  0xe0   : > { %v903_v26 = vrot.slane %v896_v45, %v2515_v57  ;;  %v930_v46 = vcombine.low %v522_v40, %v538_v3  ;;  %v837_v14 = vcombine.high %v2775_v16, %v2772_v36  ;;  %v1278_v39 = vcombine.low %v2825_v11, %v2807_v38 }
  0xe1   : > { %v862_v1 = vcombine.low %v490_v53, %v506_v5  ;;  %v675_v43 = vshrl.u32 %v2778_v61, 16  ;;  %v543_v12 = vshrl.u32 %v2780_v21, 16  ;;  %v854_v33 = vcombine.low %v482_v42, %v498_v48 }
  0xe2   : > { %v904_v6 = vcombine.low %v895_v27, %v903_v26  ;;  %v905_v4 = vcombine.high %v895_v27, %v903_v26  ;;  %v2800_v44 = vrot.slane %v930_v46, %v2515_v57  ;;  %v1943_v15 = vcombine.low %v2833_v51, %v2836_v22 }
  0xe3   : > { %v2802_v30 = vpop.permute.xlu1 %410  ;;  %v2804_v60 = vpop.permute.xlu0 %408  ;;  %v2855_v37 = vrot.slane %v862_v1, %v2515_v57  ;;  %v1210_v16 = vcombine.low %v2822_v41, %v2828_v58  ;;  %v2861_v7 = vrot.slane %v837_v14, %v2545_v32  ;;  %v861_v28 = vrot.slane %v854_v33, %v2515_v57 }
  0xe4   : > { %v2815_v13 = vrot.slane %v904_v6, %v2545_v32  ;;  %v938_v62 = vcombine.low %v2797_v63, %v2800_v44  ;;  %v939_v35 = vcombine.high %v2797_v63, %v2800_v44  ;;  %v676_v23 = vshrl.u32 %v2802_v30, 16 }
  0xe5   : > { %v544_v49 = vshrl.u32 %v2804_v60, 16  ;;  %v2852_v25 = vrot.slane %v905_v4, %v2545_v32  ;;  %v1286_v59 = vrot.slane %v1278_v39, %v2545_v32  ;;  %v1218_v47 = vrot.slane %v1210_v16, %v2545_v32 }
  0xe6   : > { %v1962_v34 = vcombine.high %v2812_v18, %v2815_v13  ;;  %v1907_v36 = vcombine.low %v2812_v18, %v2815_v13  ;;  %v677_v19 = vpack.i.b16 %v676_v23, %v675_v43  ;;  %v870_v50 = vcombine.low %v861_v28, %v2855_v37 }
  0xe7   : > { %v415_v8 = vpop.permute.xlu1 %414  ;;  %v413_v24 = vpop.permute.xlu0 %412  ;;  %v545_v3 = vpack.i.b16 %v544_v49, %v543_v12  ;;  %v1919_v29 = vcombine.low %v2861_v7, %v2852_v25  ;;  %v542_v4 = vpack.i.b16 %v2804_v60, %v2780_v21  ;;  %v1934_v9 = vcombine.low %v1218_v47, %v1286_v59 }
  0xe8   : > { %1411 = vrot.lane.b32.xlu0 %v1962_v34, %s2107_s4  ;;  %v681_v54 = vshrl.u32 %v415_v8, 16  ;;  %v549_v55 = vshrl.u32 %v413_v24, 16  ;;  %v2873_v6 = vrot.slane %v677_v19, %v2515_v57  ;;  %v946_v52 = vrot.slane %v938_v62, %v2545_v32 }
  0xe9   : > { %v2878_v31 = vrot.slane %v545_v3, %v2515_v57  ;;  %v878_v60 = vrot.slane %v870_v50, %v2545_v32  ;;  %v963_v34 = vrot.slane %v542_v4, %v2515_v57  ;;  %v1977_v12 = vcombine.high %v1218_v47, %v1286_v59  ;;  %v1758_v4 = vld [vmem:[%s3069_s2] sm:$0xff] }
  0xea   : > { %v1980_v19 = vcombine.high %v2833_v51, %v2836_v22  ;;  %v2114_v47 = vmov 0  }
  0xeb   : > { %v419_v40 = vpop.permute.xlu1 %418  ;;  %v417_v2 = vpop.permute.xlu0 %416  ;;  %v1965_v33 = vcombine.high %v878_v60, %v946_v52  ;;  %1805 = vmatprep.mubr.bf16.mxu0 %v2114_v47  ;;  %2038 = vset.pattern.permute.xlu0 %v2114_v47 }
  0xec   : > { %v682_v45 = vshrl.u32 %v419_v40, 16  ;;  %v550_v10 = vshrl.u32 %v417_v2, 16  ;;  %1595 = vrot.lane.b32.xlu0 %v1943_v15, %s2108_s5  ;;  %v548_v17 = vpack.i.b16 %v417_v2, %v413_v24  ;;  %v680_v5 = vpack.i.b16 %v419_v40, %v415_v8 }
  0xed   : > { %v674_v24 = vpack.i.b16 %v2802_v30, %v2778_v61  ;;  %v1910_v8 = vcombine.low %v878_v60, %v946_v52  ;;  %v1279_v61 = vcombine.high %v2825_v11, %v2807_v38  ;;  %v871_v40 = vcombine.high %v861_v28, %v2855_v37 }
  0xee   : > { %v683_v27 = vpack.i.b16 %v682_v45, %v681_v54  ;;  %v551_v26 = vpack.i.b16 %v550_v10, %v549_v55  ;;  %v971_v48 = vrot.slane %v548_v17, %v2515_v57  ;;  %v1311_v42 = vrot.slane %v680_v5, %v2515_v57 }
  0xef   : > { %v1303_v43 = vrot.slane %v674_v24, %v2515_v57  ;;  %v1293_v55 = vrot.slane %v1279_v61, %v2545_v32  ;;  %v885_v15 = vrot.slane %v871_v40, %v2545_v32  ;;  %v3087_v24 = vcombine.low %v2555_v0, %v2561_v56 }
  0xf0   : > { %v2868_v46 = vrot.slane %v683_v27, %v2515_v57  ;;  %v2881_v20 = vrot.slane %v551_v26, %v2515_v57  ;;  %1449 = vrot.lane.b32.xlu0 %v1919_v29, %s2108_s5  ;;  %v972_v14 = vcombine.low %v963_v34, %v971_v48  ;;  %v1211_v57 = vcombine.high %v2822_v41, %v2828_v58 }
  0xf1   : > { %v1312_v30 = vcombine.low %v1303_v43, %v1311_v42  ;;  %v953_v58 = vrot.slane %v939_v35, %v2545_v32  ;;  %v973_v45 = vcombine.high %v963_v34, %v971_v48  ;;  %v1313_v37 = vcombine.high %v1303_v43, %v1311_v42 }
  0xf2   : > { %v1346_v53 = vcombine.low %v2873_v6, %v2868_v46  ;;  %v1006_v21 = vcombine.low %v2878_v31, %v2881_v20  ;;  %v2904_v49 = vrot.slane %v972_v14, %v2545_v32  ;;  %v1225_v11 = vrot.slane %v1211_v57, %v2545_v32 }
  0xf3   : > { %v2914_v38 = vrot.slane %v1312_v30, %v2545_v32  ;;  %v1922_v10 = vcombine.low %v885_v15, %v953_v58  ;;  %v987_v63 = vrot.slane %v973_v45, %v2545_v32  ;;  %v1347_v44 = vcombine.high %v2873_v6, %v2868_v46 }
  0xf4   : > { %1538 = vrot.lane.b32.xlu0 %v1934_v9, %s2109_s6  ;;  %v1014_v62 = vrot.slane %v1006_v21, %v2545_v32  ;;  %v1354_v39 = vrot.slane %v1346_v53, %v2545_v32  ;;  %v1963_v54 = vcombine.high %v2904_v49, %v2904_v49  ;;  %v1946_v2 = vcombine.low %v1225_v11, %v1293_v55 }
  0xf5   : > { %v1975_v41 = vcombine.high %v2914_v38, %v2914_v38  ;;  %v1968_v35 = vcombine.high %v2861_v7, %v2852_v25  ;;  %v1920_v28 = vcombine.low %v987_v63, %v987_v63  ;;  %v1327_v27 = vrot.slane %v1313_v37, %v2545_v32 }
  0xf6   : > { %v1911_v1 = vcombine.low %v1014_v62, %v1014_v62  ;;  %v1935_v23 = vcombine.low %v1354_v39, %v1354_v39  ;;  %v1966_v16 = vcombine.high %v1014_v62, %v1014_v62  ;;  %v1978_v3 = vcombine.high %v1354_v39, %v1354_v39  ;;  %v3089_v39 = vld [vmem:[#allocation6_spill] sm:$0xff] }
  0xf7   : > { %v1007_v51 = vcombine.high %v2878_v31, %v2881_v20  ;;  %v1983_v22 = vcombine.high %v1225_v11, %v1293_v55  ;;  %v1944_v26 = vcombine.low %v1327_v27, %v1327_v27  ;;  %v1361_v59 = vrot.slane %v1347_v44, %v2545_v32 }
  0xf8   : > { %1392 = vrot.lane.b32.xlu0 %v1910_v8, %s2109_s6  ;;  %1394 = vrot.lane.b32.xlu1 %v1911_v1, %s2109_s6  ;;  %v1971_v17 = vcombine.high %v885_v15, %v953_v58  ;;  %v1981_v46 = vcombine.high %v1327_v27, %v1327_v27  ;;  %v1969_v50 = vcombine.high %v987_v63, %v987_v63  ;;  %v3088_v1 = vld [vmem:[#allocation5_spill] sm:$0xff] }
  0xf9   : > { %v1947_v25 = vcombine.low %v1361_v59, %v1361_v59  ;;  %v1021_v7 = vrot.slane %v1007_v51, %v2545_v32  ;;  %v1984_v6 = vcombine.high %v1361_v59, %v1361_v59  ;;  %v3090_v43 = vcombine.low %v3088_v1, %v3089_v39  ;;  %v3092_v59 = vld [vmem:[#allocation8_spill] sm:$0xff] }
  0xfa   : > { %v1908_v1 = vcombine.low %v2904_v49, %v2904_v49 }
  0xfb   : > { %v1923_v29 = vcombine.low %v1021_v7, %v1021_v7  ;;  %v1972_v32 = vcombine.high %v1021_v7, %v1021_v7 }
  0xfc   : > { %1576 = vrot.lane.b32.xlu0 %v1977_v12, %s2110_s7  ;;  %1540 = vrot.lane.b32.xlu1 %v1935_v23, %s2109_s6  ;;  %s2115_s6 = smov [#allocation2]  }
 0x100   : > { %1430 = vrot.lane.b32.xlu0 %v1965_v33, %s2110_s7  ;;  %1413 = vrot.lane.b32.xlu1 %v1963_v54, %s2107_s4 }
 0x104   : > { %1614 = vrot.lane.b32.xlu0 %v1946_v2, %s2112_s9  ;;  %1559 = vrot.lane.b32.xlu1 %v1975_v41, %s2107_s4  ;;  %s3025_s4 = scalar_lea.hbm %s3070_s3, %s1985_s26 }
 0x108   : > { %1468 = vrot.lane.b32.xlu0 %v1922_v10, %s2112_s9  ;;  %1432 = vrot.lane.b32.xlu1 %v1966_v16, %s2110_s7 }
 0x10c   : > { %1633 = vrot.lane.b32.xlu0 %v1980_v19, %s2111_s8  ;;  %1578 = vrot.lane.b32.xlu1 %v1978_v3, %s2110_s7  ;;  %s2043_s7 = sshll.u32 %s2115_s6, 4  ;;  %s2044_s7 = int_to_ptr.vmem [resolvable:$false] %s2043_s7 }
 0x10d   : > { %p2046_p0 = scmp.lt.s32.totalorder %s3027_s28, %s2044_s7 }
 0x110   : > { %1487 = vrot.lane.b32.xlu0 %v1968_v35, %s2111_s8  ;;  %1451 = vrot.lane.b32.xlu1 %v1920_v28, %s2108_s5 }
 0x114   : > { %1652 = vrot.lane.b32.xlu0 %v1983_v22, %s2113_s10  ;;  %1597 = vrot.lane.b32.xlu1 %v1944_v26, %s2108_s5  ;;  %v3091_v26 = vld [vmem:[#allocation7_spill] sm:$0xff]  ;;  %s2039_s5 = scalar_lea.vmem %s3027_s28, 256 }
 0x115   : > { %p2040_p11 = scmp.ne.s32.totalorder %s3027_s28, %s2039_s5 }
 0x117   : > { %p2041_p12 = pnand %p2040_p11, %p2174_p5 }
 0x118   : > { %1506 = vrot.lane.b32.xlu0 %v1971_v17, %s2113_s10  ;;  %1616 = vrot.lane.b32.xlu1 %v1947_v25, %s2112_s9  ;;  %v3093_v17 = vcombine.low %v3091_v26, %v3092_v59 }
 0x119   : > { %p2042_p13 = pneg %p2041_p12 }
 0x11a   : > { %v1556_v20 = vpop.permute.xlu0 %1555 }
 0x11c   : > { %1470 = vrot.lane.b32.xlu0 %v1923_v29, %s2112_s9  ;;  %1635 = vrot.lane.b32.xlu1 %v1981_v46, %s2111_s8 }
 0x11e   : > { %v1594_v5 = vpop.permute.xlu0 %1593 }
 0x120   : > { %1489 = vrot.lane.b32.xlu0 %v1969_v50, %s2111_s8  ;;  %1654 = vrot.lane.b32.xlu1 %v1984_v6, %s2113_s10  ;;  %s2045_s8 = scalar_lea.vmem %s2044_s7, 512 }
 0x121   : > { %p2047_p1 = scmp.lt.s32.totalorder %s2045_s8, %s2039_s5 }
 0x122   : > { %v1537_v48 = vpop.permute.xlu0 %1536 }
 0x123   : > { %v1712_v34 = vsel %vm1656_vm6, %v3087_v24, %v1537_v48  ;;  %v1932_v24 = vcombine.low %v2914_v38, %v2914_v38  ;;  %p2048_p2 = por %p2047_p1, %p2046_p0 }
 0x124   : > { %1508 = vrot.lane.b32.xlu0 %v1972_v32, %s2113_s10  ;;  %v1720_v8 = vsel %vm1666_vm7, %v1712_v34, %v1556_v20 }
 0x125   : > { %p2049_p3 = pnand %p2048_p2, %p2042_p13 }
 0x126   : > { %v1575_v62 = vpop.permute.xlu0 %1574 }
 0x127   : > { %v1726_v14 = vsel %vm1673_vm8, %v1720_v8, %v1575_v62 }
 0x128   : > { %1761 = vperm.xlu0 %2038, %v1758_v4   ;;  %v1732_v0 = vsel %vm1680_vm9, %v1726_v14, %v1594_v5 }
 0x12a   : > { %v1410_v31 = vpop.permute.xlu1 %1409 }
 0x12e   : > { %v1448_v9 = vpop.permute.xlu1 %1447 }
 0x132   : > { %v1632_v52 = vpop.permute.xlu1 %1631 }
 0x136   : > { %v1486_v53 = vpop.permute.xlu1 %1485 }
 0x13a   : > { %v1391_v21 = vpop.permute.xlu1 %1390 }
 0x13b   : > { %v1659_v61 = vsel %vm1656_vm6, %v3090_v43, %v1391_v21 }
 0x13c   : > { %v1668_v30 = vsel %vm1666_vm7, %v1659_v61, %v1410_v31 }
 0x13e   : > { %v1429_v60 = vpop.permute.xlu1 %1428 }
 0x13f   : > { %v1675_v12 = vsel %vm1673_vm8, %v1668_v30, %v1429_v60 }
 0x140   : > { %v1682_v57 = vsel %vm1680_vm9, %v1675_v12, %v1448_v9 }
 0x142   : > { %v1613_v42 = vpop.permute.xlu1 %1612  ;;  %v1558_v58 = vpop.permute.xlu0 %1557 }
 0x143   : > { %v1738_v23 = vsel %vm1687_vm10, %v1732_v0, %v1613_v42 }
 0x144   : > { %v1744_v54 = vsel %vm1694_vm11, %v1738_v23, %v1632_v52 }
 0x146   : > { %v1467_v56 = vpop.permute.xlu1 %1466 }
 0x147   : > { %v1689_v55 = vsel %vm1687_vm10, %v1682_v57, %v1467_v56 }
 0x148   : > { %v1696_v2 = vsel %vm1694_vm11, %v1689_v55, %v1486_v53 }
 0x14a   : > { %v1651_v33 = vpop.permute.xlu1 %1650 }
 0x14b   : > { %v1750_v11 = vsel %vm1701_vm12, %v1744_v54, %v1651_v33 }
 0x14c   : > { %1773 = vmatprep.subr.bf16.mxu0 %v1750_v11 }
 0x14e   : > { %v1505_v40 = vpop.permute.xlu1 %1504 }
 0x14f   : > { %v1703_v41 = vsel %vm1701_vm12, %v1696_v2, %v1505_v40  ;;  %v1757_v2 = vld [vmem:[%s3068_s1] sm:$0xf] }
 0x150   : > { %1774 = vmatpush1.bf16.msra.mxu0 %v1703_v41 }
 0x15a   : > { %v1412_v15 = vpop.permute.xlu0 %1411 }
 0x15e   : > { %v1596_v45 = vpop.permute.xlu0 %1595 }
 0x162   : > { %v1450_v10 = vpop.permute.xlu0 %1449 }
 0x166   : > { %v1539_v16 = vpop.permute.xlu0 %1538 }
 0x167   : > { %v1715_v25 = vsel %vm1656_vm6, %v3093_v17, %v1539_v16 }
 0x168   : > { %v1722_v46 = vsel %vm1666_vm7, %v1715_v25, %v1558_v58 }
 0x16a   : > { %v1393_v37 = vpop.permute.xlu0 %1392  ;;  %v1395_v19 = vpop.permute.xlu1 %1394 }
 0x16b   : > { %v1662_v47 = vsel %vm1656_vm6, %v1907_v36, %v1393_v37  ;;  %v1665_v61 = vsel %vm1656_vm6, %v1908_v1, %v1395_v19 }
 0x16c   : > { %v1670_v4 = vsel %vm1666_vm7, %v1662_v47, %v1412_v15 }
 0x16e   : > { %v1577_v3 = vpop.permute.xlu0 %1576  ;;  %v1541_v63 = vpop.permute.xlu1 %1540 }
 0x16f   : > { %v1728_v50 = vsel %vm1673_vm8, %v1722_v46, %v1577_v3  ;;  %v1718_v62 = vsel %vm1656_vm6, %v1932_v24, %v1541_v63 }
 0x170   : > { %v1734_v31 = vsel %vm1680_vm9, %v1728_v50, %v1596_v45 }
 0x172   : > { %v1431_v44 = vpop.permute.xlu0 %1430  ;;  %v1414_v35 = vpop.permute.xlu1 %1413 }
 0x173   : > { %v1677_v20 = vsel %vm1673_vm8, %v1670_v4, %v1431_v44  ;;  %v1672_v30 = vsel %vm1666_vm7, %v1665_v61, %v1414_v35 }
 0x174   : > { %v1684_v13 = vsel %vm1680_vm9, %v1677_v20, %v1450_v10 }
 0x176   : > { %v1615_v28 = vpop.permute.xlu0 %1614  ;;  %v1560_v27 = vpop.permute.xlu1 %1559 }
 0x177   : > { %v1740_v9 = vsel %vm1687_vm10, %v1734_v31, %v1615_v28  ;;  %v1724_v8 = vsel %vm1666_vm7, %v1718_v62, %v1560_v27 }
 0x17a   : > { %v1469_v51 = vpop.permute.xlu0 %1468  ;;  %v1433_v22 = vpop.permute.xlu1 %1432 }
 0x17b   : > { %v1691_v36 = vsel %vm1687_vm10, %v1684_v13, %v1469_v51  ;;  %v1679_v23 = vsel %vm1673_vm8, %v1672_v30, %v1433_v22 }
 0x17e   : > { %v1634_v7 = vpop.permute.xlu0 %1633  ;;  %v1579_v29 = vpop.permute.xlu1 %1578 }
 0x17f   : > { %v1746_v52 = vsel %vm1694_vm11, %v1740_v9, %v1634_v7  ;;  %v1730_v39 = vsel %vm1673_vm8, %v1724_v8, %v1579_v29 }
 0x182   : > { %v1488_v6 = vpop.permute.xlu0 %1487  ;;  %v1452_v32 = vpop.permute.xlu1 %1451 }
 0x183   : > { %v1698_v48 = vsel %vm1694_vm11, %v1691_v36, %v1488_v6  ;;  %v1686_v57 = vsel %vm1680_vm9, %v1679_v23, %v1452_v32 }
 0x186   : > { %v1653_v5 = vpop.permute.xlu0 %1652  ;;  %v1598_v53 = vpop.permute.xlu1 %1597 }
 0x187   : > { %v1753_v18 = vsel %vm1701_vm12, %v1746_v52, %v1653_v5  ;;  %v1736_v43 = vsel %vm1680_vm9, %v1730_v39, %v1598_v53 }
 0x188   : > { %1775 = vmatprep.subr.bf16.mxu0 %v1753_v18 }
 0x18a   : > { %v1507_v21 = vpop.permute.xlu0 %1506  ;;  %v1617_v60 = vpop.permute.xlu1 %1616 }
 0x18b   : > { %v1706_v34 = vsel %vm1701_vm12, %v1698_v48, %v1507_v21  ;;  %v1742_v38 = vsel %vm1687_vm10, %v1736_v43, %v1617_v60 }
 0x18c   : > { %1776 = vmatpush1.bf16.msra.mxu0 %v1706_v34 }
 0x18e   : > { %v1471_v42 = vpop.permute.xlu0 %1470  ;;  %v1636_v14 = vpop.permute.xlu1 %1635 }
 0x18f   : > { %v1748_v0 = vsel %vm1694_vm11, %v1742_v38, %v1636_v14  ;;  %v1693_v33 = vsel %vm1687_vm10, %v1686_v57, %v1471_v42 }
 0x192   : > { %v1490_v56 = vpop.permute.xlu0 %1489  ;;  %v1655_v12 = vpop.permute.xlu1 %1654 }
 0x193   : > { %v1756_v49 = vsel %vm1701_vm12, %v1748_v0, %v1655_v12  ;;  %v1700_v54 = vsel %vm1694_vm11, %v1693_v33, %v1490_v56 }
 0x194   : > { %1954 = vmatprep.subr.msk.bf16.mxu0 %vm1768_vm13, %v1756_v49 }
 0x196   : > { %v1509_v55 = vpop.permute.xlu0 %1508 }
 0x197   : > { %v1709_v11 = vsel %vm1701_vm12, %v1700_v54, %v1509_v55 }
 0x198   : > { %v1769_v40 = vsel %vm1768_vm13, %v1709_v11, 0 }
 0x199   : > { %1778 = vmatpush1.bf16.msra.mxu0 %v1769_v40 }
 0x19c   : > { %1955 = vmatmul.mubr.msk.bf16.vlgmr.msra.gmra.mrb[0].mxu0 %vm1764_vm14, %v1757_v2 }
 0x1a7   : > { %v1762_v41 = vpop.permute.xlu0 %1761 }
 0x26f   : > { %v1807_v58 = vpop.f32.mrb[0].mxu0 }
 0x270   : > { %v1808_v15 = vadd.f32 %v1807_v58, %v1762_v41  ;;  %v1809_v45 = vpop.f32.mrb[1].mxu0 }
 0x271   : > { %v1810_v10 = vadd.f32 %v1809_v45, %v1762_v41  ;;  %v1811_v16 = vpop.f32.mrb[2].mxu0 }
 0x272   : > { %vm1814_vm15 = vcmp.ge.f32.partialorder %v1808_v15, 0.0  ;;  %v1816_v37 = vmul.f32 0.01, %v1808_v15  ;;  %v1812_v19 = vpop.f32.mrb[3].mxu0 }
 0x273   : > { %vm1815_vm0 = vcmp.ge.f32.partialorder %v1810_v10, 0.0  ;;  %v1817_v3 = vmul.f32 0.01, %v1810_v10 }
 0x274   : > { %v1818_v63 = vsel %vm1814_vm15, %v1808_v15, %v1816_v37 }
 0x275   : > { %v1819_v44 = vsel %vm1815_vm0, %v1810_v10, %v1817_v3  ;;  %1820 = vst [vmem:[%s163_s27] sm:$0xff] %v1818_v63 }
 0x276   : > { %1821 = vst [vmem:[%s163_s27 + $0x8] sm:$0xff] %v1819_v44 }
 0x277   : > { %2052 = shalt.err (!%p2049_p3)
}
 0x278   : > { %s2053_s9 = scalar_lea.hbm %s3025_s4, 256  ;;  %s2057_s17 = scalar_lea.hbm %s3070_s3, 512 }
 0x279   : > { %p2054_p4 = scmp.ne.s32.totalorder %s3025_s4, %s2053_s9  ;;  %p2058_p9 = scmp.lt.u32.totalorder %s3025_s4, %s3070_s3 }
 0x27a   : > { %p2059_p10 = scmp.lt.u32.totalorder %s2057_s17, %s2053_s9  ;;  %p2061_p12 = scmp.lt.u32.totalorder %s2053_s9, %s3025_s4 }
 0x27b   : > { %p2055_p7 = pnand %p2054_p4, %p2174_p5 }
 0x27c   : > { %p2060_p11 = por %p2059_p10, %p2058_p9 }
 0x27d   : > { %p2056_p8 = pneg %p2055_p7 }
 0x27e   : > { %p2062_p13 = por %p2061_p12, %p2060_p11 }
 0x280   : > { %p2063_p0 = pnand %p2062_p13, %p2056_p8 }
 0x282   : > { %2066 = shalt.err (!%p2063_p0)
}
 0x283   : > { %1987 = dma.vmem_to_hbm [thread:$0]  (%p2174_p5), %s3027_s28, 256, %s3025_s4, %s1823_s16  }
 0x284 PF: > { %p1993_p1 = scmp.ge.s32.totalorder %s2101_s15, 2  ;;  %s1849_s24 = sand.u32 1, %s2089_s12  }
 0x285   : > { %s1850_s25 = scalar_lea.sflag [#allocation3], %s1849_s24 }
 0x286   : > { %p1990_p2 = pnand %p1993_p1, %p2178_p6 }
 0x288   : > { %2084 = dma.done.wait (!%p1990_p2), %s1850_s25, 256  }
 0x289   : > { %2086 = vsyncadd (!%p1990_p2), %s1850_s25, 4294967040  ;;  %p13_p3 = scmp.ge.s32.totalorder %s2161_s18, 4   ;;  %s3094_s12 = smov %s2093_s13 }
 0x28a   : > { %s3095_s13 = smov %s2097_s14  ;;  %s3096_s14 = smov %s2172_s21 }
 0x28b   : > { %s3097_s15 = smov %s2161_s18  ;;  %15 = sbr.rel (!%p13_p3) target bundleno = 3 (0x3), region = 67 }
 0x292   :  { %1855 = vsyncpa [#allocation3], 1 }
 0x293   :  { %1857 = vsyncpa [#allocation3 + $0x1], 1 }

</bundles_post_ra>
